<compile_context>
chip_gen: v5e
topology: v5e:2x2
jax: 0.10.0
libtpu: 0.0.40
codegen_flags: <defaults>
</compile_context>

<pallas_src>
import functools

import jax
import jax.numpy as jnp
import numpy as np
from jax.experimental import pallas as pl
from jax.experimental.pallas import tpu as pltpu


LANE = 128          # lane width of a vreg
SUBLANE_BF16 = 16   # bf16 rows packed per sublane group -> keep TILE_B % 16 == 0
H1 = 256            # hidden 1 (lane-aligned)
H2 = 256            # hidden 2 (lane-aligned)
H3 = 64             # hidden 3 (logical)
H3_P = 128          # hidden 3 padded to a full lane tile


def _round_up(x, m):
    return (x + m - 1) // m * m


def _pad2(a, rows, cols):
    r, c = a.shape
    return jnp.pad(a, ((0, rows - r), (0, cols - c)))


# ----------------------------- Pallas kernel ------------------------------

def qnetwork_kernel(x_ref, w1_ref, w2_ref, w3_ref, w4_ref, b_ref, o_ref, *,
                    a_pad):
    """One batch tile of the fused 4-layer MLP (4 bf16 matmuls, f32 accum)."""
    h = jnp.dot(x_ref[...], w1_ref[...], preferred_element_type=jnp.float32)
    h = jnp.maximum(h + b_ref[0:1, :H1], 0.0).astype(jnp.bfloat16)

    h = jnp.dot(h, w2_ref[...], preferred_element_type=jnp.float32)
    h = jnp.maximum(h + b_ref[1:2, :H2], 0.0).astype(jnp.bfloat16)

    h = jnp.dot(h, w3_ref[...], preferred_element_type=jnp.float32)
    h = jnp.maximum(h + b_ref[2:3, :H3_P], 0.0).astype(jnp.bfloat16)

    q = jnp.dot(h, w4_ref[...], preferred_element_type=jnp.float32)
    o_ref[...] = q + b_ref[3:4, :a_pad]


# -------------------- one-time parameter preparation -----------------------

def prepare_params(params):
    """Pad to lane-aligned shapes, cast weights to bf16, stack biases.

    Call ONCE (outside the acting / training loop) and reuse the result for
    every qnetwork_forward call; this removes all per-call pad/cast XLA ops.
    Zero padding keeps the math exact.
    """
    C = params["w1"].shape[0]
    A = params["w4"].shape[1]
    C_p = _round_up(max(C, LANE), LANE)
    A_p = _round_up(max(A, LANE), LANE)
    BW = max(H1, H2, H3_P, A_p)          # stacked-bias lane width

    w1 = _pad2(params["w1"], C_p, H1).astype(jnp.bfloat16)
    w2 = _pad2(params["w2"], H1, H2).astype(jnp.bfloat16)
    w3 = _pad2(params["w3"], H2, H3_P).astype(jnp.bfloat16)
    w4 = _pad2(params["w4"], H3_P, A_p).astype(jnp.bfloat16)

    # Biases stacked into one (8, BW) f32 array (row 0..3 used, rest zero) so a
    # single aligned DMA replaces four tiny sub-sublane transfers.
    biases = jnp.zeros((8, BW), jnp.float32)
    biases = biases.at[0, :H1].set(params["b1"].reshape(-1))
    biases = biases.at[1, :H2].set(params["b2"].reshape(-1))
    biases = biases.at[2, :H3].set(params["b3"].reshape(-1))
    biases = biases.at[3, :A].set(params["b4"].reshape(-1))

    return {
        "w1": w1, "w2": w2, "w3": w3, "w4": w4, "biases": biases,
        "dims": (C, C_p, A, A_p, BW),
    }


# ------------------------------- tiling ------------------------------------

def _choose_tiling(batch, tile_cap=256):
    """Pick (TILE_B, B_pad, n_steps) for the batch axis.

    * B is padded only to a multiple of 16 (bf16 sublane packing), never to a
      full tile, so awkward batch sizes don't ~double the work.
    * Tiles are capped at `tile_cap` (256 fills the v6e/v7x MXU M dimension).
    * When B_pad >= 256 we force at least 2 grid steps (each >= 128 rows) so
      the "parallel" axis shards across both v7x TensorCores; weights are only
      DMA'd once per core thanks to the constant index_map.
    """
    b_pad = _round_up(max(batch, SUBLANE_BF16), SUBLANE_BF16)
    n_steps = -(-b_pad // tile_cap)
    if n_steps == 1 and b_pad >= 256:
        n_steps = 2
    tile_b = _round_up(-(-b_pad // n_steps), SUBLANE_BF16)
    return tile_b, tile_b * n_steps, n_steps


# ------------------------------- wrapper -----------------------------------

def qnetwork_forward(x, prepped, *, tile_cap=256):
    """x: [B, num_channels] float32; prepped: output of prepare_params().

    Returns q-values [B, num_actions] float32 (bf16 matmuls, f32 accumulation).
    """
    C, C_p, A, A_p, BW = prepped["dims"]
    B = x.shape[0]
    assert x.shape[1] == C, "input feature dim mismatch with prepared params"

    TILE_B, B_p, n_steps = _choose_tiling(B, tile_cap)

    # Only the batch input is padded / cast per call.
    x_p = jnp.pad(x.astype(jnp.bfloat16), ((0, B_p - B), (0, C_p - C)))

    def batch_map(i):          # activation / output tiles march down the batch
        return (i, 0)

    def const_map(i):          # weights & biases stay VMEM-resident
        return (0, 0)

    in_specs = [
        pl.BlockSpec((TILE_B, C_p), batch_map),   # x tile (bf16)
        pl.BlockSpec((C_p, H1), const_map),       # w1 (bf16)
        pl.BlockSpec((H1, H2), const_map),        # w2 (bf16)
        pl.BlockSpec((H2, H3_P), const_map),      # w3 (bf16)
        pl.BlockSpec((H3_P, A_p), const_map),     # w4 (bf16)
        pl.BlockSpec((8, BW), const_map),         # stacked biases (f32)
    ]
    out_spec = pl.BlockSpec((TILE_B, A_p), batch_map)

    flops = 2 * B_p * (C_p * H1 + H1 * H2 + H2 * H3_P + H3_P * A_p)
    bytes_accessed = (
        2 * (x_p.size + prepped["w1"].size + prepped["w2"].size
             + prepped["w3"].size + prepped["w4"].size)        # bf16
        + 4 * (prepped["biases"].size + B_p * A_p))            # f32

    kernel = functools.partial(qnetwork_kernel, a_pad=A_p)

    q_p = pl.pallas_call(
        kernel,
        out_shape=jax.ShapeDtypeStruct((B_p, A_p), jnp.float32),
        grid=(n_steps,),
        in_specs=in_specs,
        out_specs=out_spec,
        compiler_params=pltpu.CompilerParams(
            dimension_semantics=("parallel",)),
        cost_estimate=pl.CostEstimate(
            flops=flops, transcendentals=0, bytes_accessed=bytes_accessed),
    )(x_p, prepped["w1"], prepped["w2"], prepped["w3"], prepped["w4"],
      prepped["biases"])

    return q_p[:B, :A]


# ------------------------- deterministic init glue -------------------------

def kaiming_uniform(key, fan_in, fan_out):
    """torch.nn.init.kaiming_uniform_ (a=0, fan_in mode, gain=sqrt(2)):
    bound = sqrt(2) * sqrt(3 / fan_in). Returned already transposed to
    [in, out] for x @ W."""
    bound = np.sqrt(2.0) * np.sqrt(3.0 / fan_in)
    return jax.random.uniform(key, (fan_in, fan_out), jnp.float32,
                              minval=-bound, maxval=bound)


def init_qnetwork_params(key, num_channels, num_actions):
    k1, k2, k3, k4 = jax.random.split(key, 4)
    # TODO(synk): the head's final Linear uses PyTorch's default init in the
    # original module (initialize_weights_he is applied only to DQNBase.net);
    # a deterministic Kaiming init is used here for the synthetic test.
    return {
        # DQNBase (self.conv): Linear(C,256) -> ReLU -> Linear(256,256) -> ReLU
        "w1": kaiming_uniform(k1, num_channels, 256),
        "b1": jnp.zeros((1, 256), jnp.float32),
        "w2": kaiming_uniform(k2, 256, 256),
        "b2": jnp.zeros((1, 256), jnp.float32),
        # head: Linear(256,64) -> ReLU -> Linear(64, num_actions)
        "w3": kaiming_uniform(k3, 256, 64),
        "b3": jnp.zeros((1, 64), jnp.float32),
        "w4": kaiming_uniform(k4, 64, num_actions),
        "b4": jnp.zeros((1, num_actions), jnp.float32),
    }


def qnetwork_reference(x, p):
    h = jax.nn.relu(x @ p["w1"] + p["b1"])
    h = jax.nn.relu(h @ p["w2"] + p["b2"])
    h = jax.nn.relu(h @ p["w3"] + p["b3"])
    return h @ p["w4"] + p["b4"]


# --------------------------------- main ------------------------------------

if __name__ == "__main__":
    batch = 2
    num_channels = 4      # feature-vector observation (Linear input), not image
    num_actions = 6

    key = jax.random.PRNGKey(0)
    k_x, k_p = jax.random.split(key)

    states = jax.random.normal(k_x, (batch, num_channels), jnp.float32)
    params = init_qnetwork_params(k_p, num_channels, num_actions)

    prepped = prepare_params(params)          # one-time pad + bf16 cast
    q = qnetwork_forward(states, prepped)
    q = jax.block_until_ready(q)

    # bf16 matmuls (f32 accumulation) no longer bit-match the f32 reference;
    # use loosened tolerances as recommended in the review.
    q_ref = qnetwork_reference(states, params)
    np.testing.assert_allclose(np.asarray(q), np.asarray(q_ref),
                               rtol=3e-2, atol=3e-2)

    print("KERNEL_OK")
</pallas_src>

<mosaic_0001>
module attributes {stable_mosaic.version = 11 : i64} {
  func.func @qnetwork_kernel(%arg0: i32, %arg1: memref<16x128xbf16, #tpu.memory_space<vmem>>, %arg2: memref<128x256xbf16, #tpu.memory_space<vmem>>, %arg3: memref<256x256xbf16, #tpu.memory_space<vmem>>, %arg4: memref<256x128xbf16, #tpu.memory_space<vmem>>, %arg5: memref<128x128xbf16, #tpu.memory_space<vmem>>, %arg6: memref<8x256xf32, #tpu.memory_space<vmem>>, %arg7: memref<16x128xf32, #tpu.memory_space<vmem>>) attributes {dimension_semantics = [#tpu.dimension_semantics<parallel>], iteration_bounds = array<i64: 1>, scalar_prefetch = 0 : i64, scratch_operands = 0 : i64, tpu.core_type = #tpu.core_type<tc>, window_params = [{transform_indices = @transform_0, window_bounds = array<i64: 16, 128>}, {pipeline_mode = #tpu.pipeline_mode<synchronous>, transform_indices = @transform_1, window_bounds = array<i64: 128, 256>}, {pipeline_mode = #tpu.pipeline_mode<synchronous>, transform_indices = @transform_2, window_bounds = array<i64: 256, 256>}, {pipeline_mode = #tpu.pipeline_mode<synchronous>, transform_indices = @transform_3, window_bounds = array<i64: 256, 128>}, {pipeline_mode = #tpu.pipeline_mode<synchronous>, transform_indices = @transform_4, window_bounds = array<i64: 128, 128>}, {pipeline_mode = #tpu.pipeline_mode<synchronous>, transform_indices = @transform_5, window_bounds = array<i64: 8, 256>}, {transform_indices = @transform_6, window_bounds = array<i64: 16, 128>}]} {
    %c0 = arith.constant 0 : index
    %c0_0 = arith.constant 0 : index
    %0 = vector.load %arg1[%c0, %c0_0] : memref<16x128xbf16, #tpu.memory_space<vmem>>, vector<16x128xbf16>
    %c0_1 = arith.constant 0 : index
    %c0_2 = arith.constant 0 : index
    %1 = vector.load %arg2[%c0_1, %c0_2] : memref<128x256xbf16, #tpu.memory_space<vmem>>, vector<128x256xbf16>
    %cst = arith.constant dense<0.000000e+00> : vector<16x256xf32>
    %2 = tpu.matmul %0, %1, %cst {dimension_numbers = #tpu.dot_dimension_numbers<[1], [0], [0], [1], [0, 0, 1, 1], [], []>} : vector<16x128xbf16>, vector<128x256xbf16>, vector<16x256xf32> -> vector<16x256xf32>
    %c0_3 = arith.constant 0 : index
    %c0_4 = arith.constant 0 : index
    %3 = vector.load %arg6[%c0_3, %c0_4] : memref<8x256xf32, #tpu.memory_space<vmem>>, vector<1x256xf32>
    %4 = vector.broadcast %3 : vector<1x256xf32> to vector<16x256xf32>
    %5 = arith.addf %2, %4 : vector<16x256xf32>
    %cst_5 = arith.constant 0.000000e+00 : f32
    %6 = vector.broadcast %cst_5 : f32 to vector<16x256xf32>
    %7 = arith.maximumf %5, %6 : vector<16x256xf32>
    %8 = arith.truncf %7 : vector<16x256xf32> to vector<16x256xbf16>
    %c0_6 = arith.constant 0 : index
    %c0_7 = arith.constant 0 : index
    %9 = vector.load %arg3[%c0_6, %c0_7] : memref<256x256xbf16, #tpu.memory_space<vmem>>, vector<256x256xbf16>
    %cst_8 = arith.constant dense<0.000000e+00> : vector<16x256xf32>
    %10 = tpu.matmul %8, %9, %cst_8 {dimension_numbers = #tpu.dot_dimension_numbers<[1], [0], [0], [1], [0, 0, 1, 1], [], []>} : vector<16x256xbf16>, vector<256x256xbf16>, vector<16x256xf32> -> vector<16x256xf32>
    %c1 = arith.constant 1 : index
    %c0_9 = arith.constant 0 : index
    %11 = vector.load %arg6[%c1, %c0_9] : memref<8x256xf32, #tpu.memory_space<vmem>>, vector<1x256xf32>
    %12 = vector.broadcast %11 : vector<1x256xf32> to vector<16x256xf32>
    %13 = arith.addf %10, %12 : vector<16x256xf32>
    %cst_10 = arith.constant 0.000000e+00 : f32
    %14 = vector.broadcast %cst_10 : f32 to vector<16x256xf32>
    %15 = arith.maximumf %13, %14 : vector<16x256xf32>
    %16 = arith.truncf %15 : vector<16x256xf32> to vector<16x256xbf16>
    %c0_11 = arith.constant 0 : index
    %c0_12 = arith.constant 0 : index
    %17 = vector.load %arg4[%c0_11, %c0_12] : memref<256x128xbf16, #tpu.memory_space<vmem>>, vector<256x128xbf16>
    %cst_13 = arith.constant dense<0.000000e+00> : vector<16x128xf32>
    %18 = tpu.matmul %16, %17, %cst_13 {dimension_numbers = #tpu.dot_dimension_numbers<[1], [0], [0], [1], [0, 0, 1, 1], [], []>} : vector<16x256xbf16>, vector<256x128xbf16>, vector<16x128xf32> -> vector<16x128xf32>
    %c2 = arith.constant 2 : index
    %c0_14 = arith.constant 0 : index
    %19 = vector.load %arg6[%c2, %c0_14] : memref<8x256xf32, #tpu.memory_space<vmem>>, vector<1x128xf32>
    %20 = vector.broadcast %19 : vector<1x128xf32> to vector<16x128xf32>
    %21 = arith.addf %18, %20 : vector<16x128xf32>
    %cst_15 = arith.constant 0.000000e+00 : f32
    %22 = vector.broadcast %cst_15 : f32 to vector<16x128xf32>
    %23 = arith.maximumf %21, %22 : vector<16x128xf32>
    %24 = arith.truncf %23 : vector<16x128xf32> to vector<16x128xbf16>
    %c0_16 = arith.constant 0 : index
    %c0_17 = arith.constant 0 : index
    %25 = vector.load %arg5[%c0_16, %c0_17] : memref<128x128xbf16, #tpu.memory_space<vmem>>, vector<128x128xbf16>
    %cst_18 = arith.constant dense<0.000000e+00> : vector<16x128xf32>
    %26 = tpu.matmul %24, %25, %cst_18 {dimension_numbers = #tpu.dot_dimension_numbers<[1], [0], [0], [1], [0, 0, 1, 1], [], []>} : vector<16x128xbf16>, vector<128x128xbf16>, vector<16x128xf32> -> vector<16x128xf32>
    %c3 = arith.constant 3 : index
    %c0_19 = arith.constant 0 : index
    %27 = vector.load %arg6[%c3, %c0_19] : memref<8x256xf32, #tpu.memory_space<vmem>>, vector<1x128xf32>
    %28 = vector.broadcast %27 : vector<1x128xf32> to vector<16x128xf32>
    %29 = arith.addf %26, %28 : vector<16x128xf32>
    %c0_20 = arith.constant 0 : index
    %c0_21 = arith.constant 0 : index
    %30 = vector.load %arg7[%c0_20, %c0_21] : memref<16x128xf32, #tpu.memory_space<vmem>>, vector<16x128xf32>
    tpu.vector_store %arg7[%c0_20, %c0_21], %29 {strides = array<i32>} : memref<16x128xf32, #tpu.memory_space<vmem>>, vector<16x128xf32>,
    return
  }
  func.func @transform_0(%arg0: i32) -> (i32, i32) {
    %c0_i32 = arith.constant 0 : i32
    %c0_i32_0 = arith.constant 0 : i32
    return %arg0, %c0_i32 : i32, i32
  }
  func.func @transform_1(%arg0: i32) -> (i32, i32) {
    %c0_i32 = arith.constant 0 : i32
    %c0_i32_0 = arith.constant 0 : i32
    %c0_i32_1 = arith.constant 0 : i32
    return %c0_i32, %c0_i32_0 : i32, i32
  }
  func.func @transform_2(%arg0: i32) -> (i32, i32) {
    %c0_i32 = arith.constant 0 : i32
    %c0_i32_0 = arith.constant 0 : i32
    %c0_i32_1 = arith.constant 0 : i32
    return %c0_i32, %c0_i32_0 : i32, i32
  }
  func.func @transform_3(%arg0: i32) -> (i32, i32) {
    %c0_i32 = arith.constant 0 : i32
    %c0_i32_0 = arith.constant 0 : i32
    %c0_i32_1 = arith.constant 0 : i32
    return %c0_i32, %c0_i32_0 : i32, i32
  }
  func.func @transform_4(%arg0: i32) -> (i32, i32) {
    %c0_i32 = arith.constant 0 : i32
    %c0_i32_0 = arith.constant 0 : i32
    %c0_i32_1 = arith.constant 0 : i32
    return %c0_i32, %c0_i32_0 : i32, i32
  }
  func.func @transform_5(%arg0: i32) -> (i32, i32) {
    %c0_i32 = arith.constant 0 : i32
    %c0_i32_0 = arith.constant 0 : i32
    %c0_i32_1 = arith.constant 0 : i32
    return %c0_i32, %c0_i32_0 : i32, i32
  }
  func.func @transform_6(%arg0: i32) -> (i32, i32) {
    %c0_i32 = arith.constant 0 : i32
    %c0_i32_0 = arith.constant 0 : i32
    return %arg0, %c0_i32 : i32, i32
  }
}

</mosaic_0001>

<bundles_post_ra>
// kernel: tpu_custom_call.1
= control target key start
LH: loop header
LB: loop body
LE: loop exit
PB: predicated region body
PF: predicated region fallthrough
CT: control target
= control target key end

     0   :  { %11 = vsyncpa [#allocation3], 0  ;;  %s1414_s0 = inlined_call_operand.hbm [shape: bf16[16,128], index: 0, kind: input, shape index: {}]   ;;  %s1415_s1 = inlined_call_operand.hbm [shape: bf16[128,256], index: 1, kind: input, shape index: {}]   ;;  %s1416_s2 = inlined_call_operand.hbm [shape: bf16[256,256], index: 2, kind: input, shape index: {}]   ;;  %s1417_s3 = inlined_call_operand.hbm [shape: bf16[256,128], index: 3, kind: input, shape index: {}]   ;;  %s1418_s4 = inlined_call_operand.hbm [shape: bf16[128,128], index: 4, kind: input, shape index: {}]   ;;  %s1419_s5 = inlined_call_operand.hbm [shape: f32[8,256], index: 5, kind: input, shape index: {}]   ;;  %s1420_s6 = inlined_call_operand.hbm [shape: f32[16,128], index: 6, kind: output, shape index: {}]  }
   0x1   :  { %12 = vsyncpa [#allocation6], 0 }
   0x2   :  { %13 = vsyncpa [#allocation9], 0 }
   0x3   :  { %14 = vsyncpa [#allocation12], 0  ;;  %s33_s23 = sshll.u32 %s1415_s1, 4  ;;  %s34_s23 = int_to_ptr.hbm [resolvable:$true] %s33_s23 }
   0x4   :  { %15 = vsyncpa [#allocation4], 0  ;;  %s1338_s24 = smov [#allocation5]   ;;  %s1339_s26 = smov 128  }
   0x5   :  { %s35_s25 = sshll.u32 %s1338_s24, 4  ;;  %s1340_s27 = smov 8   ;;  %s36_s25 = int_to_ptr.vmem [resolvable:$true] %s35_s25 }
   0x6   :  { %41 = dma.hbm_to_vmem [thread:$0]  %s34_s23, 2048, %s36_s25, [#allocation6], %s1339_s26, %s1339_s26, %s1340_s27  }
   0x7   :  { %s59_s30 = sshll.u32 %s1417_s3, 4  ;;  %s1341_s7 = smov [#allocation8]   ;;  %s60_s30 = int_to_ptr.hbm [resolvable:$true] %s59_s30 }
   0x8   :  { %s61_s8 = sshll.u32 %s1341_s7, 4  ;;  %s20_s10 = sshll.u32 %s1414_s0, 4  ;;  %s62_s8 = int_to_ptr.vmem [resolvable:$true] %s61_s8  ;;  %s21_s10 = int_to_ptr.hbm [resolvable:$true] %s20_s10 }
   0x9   :  { %s1342_s11 = smov 64   ;;  %s1343_s12 = smov 4  }
   0xa   :  { %67 = dma.hbm_to_vmem [thread:$0]  %s60_s30, 2048, %s62_s8, [#allocation9], %s1342_s11, %s1342_s11, %s1343_s12  }
   0xb   :  { %s46_s15 = sshll.u32 %s1416_s2, 4  ;;  %s1344_s16 = smov [#allocation2]   ;;  %s47_s15 = int_to_ptr.hbm [resolvable:$true] %s46_s15 }
   0xc   :  { %s22_s17 = sshll.u32 %s1344_s16, 4  ;;  %s1345_s3 = smov [#allocation7]   ;;  %s23_s17 = int_to_ptr.vmem [resolvable:$true] %s22_s17 }
   0xd   :  { %28 = dma.hbm_to_vmem [thread:$0]  %s21_s10, 128, %s23_s17, [#allocation3], %s1342_s11, %s1342_s11, %s1343_s12  }
   0xe   :  { %s48_s18 = sshll.u32 %s1345_s3, 4  ;;  %s72_s0 = sshll.u32 %s1418_s4, 4  ;;  %s49_s18 = int_to_ptr.vmem [resolvable:$true] %s48_s18  ;;  %s73_s0 = int_to_ptr.hbm [resolvable:$true] %s72_s0 }
   0xf   :  { %54 = dma.hbm_to_vmem [thread:$0]  %s47_s15, 4096, %s49_s18, [#allocation6], %s1339_s26, %s1339_s26, %s1340_s27  }
  0x10   :  { %s86_s2 = sshll.u32 %s1419_s5, 4  ;;  %s1346_s23 = smov [#allocation10]   ;;  %s87_s2 = int_to_ptr.hbm [resolvable:$true] %s86_s2 }
  0x11   :  { %s74_s24 = sshll.u32 %s1346_s23, 4  ;;  %s1347_s25 = smov [#allocation11]   ;;  %s75_s24 = int_to_ptr.vmem [resolvable:$true] %s74_s24 }
  0x12   :  { %80 = dma.hbm_to_vmem [thread:$0]  %s73_s0, 1024, %s75_s24, [#allocation9], %s1342_s11, %s1342_s11, %s1343_s12  }
  0x13   :  { %s88_s28 = sshll.u32 %s1347_s25, 4  ;;  %s89_s28 = int_to_ptr.vmem [resolvable:$true] %s88_s28 }
  0x14   :  { %91 = dma.hbm_to_vmem [thread:$0]  %s87_s2, 256, %s89_s28, [#allocation12]  }
  0x15   :  { %1328 = dma.done.wait [#allocation3], 128  }
  0x16   :  { %1329 = vsyncadd [#allocation3], 4294967168 }
  0x17   :  { %1330 = dma.done.wait [#allocation6], 6144  }
  0x18   :  { %1331 = vsyncadd [#allocation6], 4294961152 }
  0x19   :  { %1332 = dma.done.wait [#allocation9], 3072  }
  0x1a   :  { %1333 = vsyncadd [#allocation9], 4294964224 }
  0x1b   :  { %1334 = dma.done.wait [#allocation12], 256  }
  0x1c   :  { %1335 = vsyncadd [#allocation12], 4294967040  ;;  %v846_v0 = vld [vmem:[#allocation5 + $0x70] sm:$0xf]  ;;  %v1092_v1 = vld [vmem:[#allocation5 + $0x74] sm:$0xf0] }
  0x1d   :  { %v1091_v2 = vld [vmem:[#allocation5 + $0x74] sm:$0xf]  ;;  %v847_v3 = vor.u32 %v1092_v1, %v846_v0  ;;  %v848_v4 = vld [vmem:[#allocation5 + $0x78] sm:$0xf0]  ;;  %v838_v5 = vld [vmem:[#allocation5 + $0x60] sm:$0xf] }
  0x1e   :  { %v1090_v6 = vld [vmem:[#allocation5 + $0x64] sm:$0xf0]  ;;  %v851_v7 = vor.u32 %v1091_v2, %v848_v4  ;;  %v1089_v8 = vld [vmem:[#allocation5 + $0x64] sm:$0xf]  ;;  %v840_v9 = vld [vmem:[#allocation5 + $0x68] sm:$0xf0] }
  0x1f   :  { %226 = vmatpush.bf16.msra.mxu0 %v847_v3  ;;  %v839_v10 = vor.u32 %v1090_v6, %v838_v5  ;;  %v843_v11 = vor.u32 %v1089_v8, %v840_v9  ;;  %v830_v12 = vld [vmem:[#allocation5 + $0x50] sm:$0xf]  ;;  %v1088_v13 = vld [vmem:[#allocation5 + $0x54] sm:$0xf0]  ;;  %v1087_v14 = vld [vmem:[#allocation5 + $0x54] sm:$0xf] }
  0x20   :  { %240 = vmatpush.bf16.msra.mxu1 %v851_v7  ;;  %v832_v15 = vld [vmem:[#allocation5 + $0x58] sm:$0xf0]  ;;  %v831_v16 = vor.u32 %v1088_v13, %v830_v12  ;;  %v822_v18 = vld [vmem:[#allocation5 + $0x40] sm:$0xf]  ;;  %v1086_v19 = vld [vmem:[#allocation5 + $0x44] sm:$0xf0] }
  0x21   :  { %v835_v17 = vor.u32 %v1087_v14, %v832_v15  ;;  %v1085_v20 = vld [vmem:[#allocation5 + $0x44] sm:$0xf]  ;;  %v824_v21 = vld [vmem:[#allocation5 + $0x48] sm:$0xf0]  ;;  %v823_v22 = vor.u32 %v1086_v19, %v822_v18  ;;  %v910_v23 = vld [vmem:[#allocation7 + $0x70] sm:$0xf] }
  0x22   :  { %v1108_v24 = vld [vmem:[#allocation7 + $0x74] sm:$0xf0]  ;;  %v974_v25 = vld [vmem:[#allocation7 + $0xf0] sm:$0xf]  ;;  %v827_v26 = vor.u32 %v1085_v20, %v824_v21  ;;  %v1083_v31 = vld [vmem:[#allocation5 + $0x34] sm:$0xf] }
  0x23   :  { %227 = vmatpush.bf16.msra.mxu0 %v839_v10  ;;  %v814_v27 = vld [vmem:[#allocation5 + $0x30] sm:$0xf]  ;;  %v1084_v28 = vld [vmem:[#allocation5 + $0x34] sm:$0xf0]  ;;  %v911_v29 = vor.u32 %v1108_v24, %v910_v23  ;;  %v816_v32 = vld [vmem:[#allocation5 + $0x38] sm:$0xf0] }
  0x24   :  { %241 = vmatpush.bf16.msra.mxu1 %v843_v11  ;;  %v1124_v30 = vld [vmem:[#allocation7 + $0xf4] sm:$0xf0]  ;;  %v902_v34 = vld [vmem:[#allocation7 + $0x60] sm:$0xf]  ;;  %v1106_v35 = vld [vmem:[#allocation7 + $0x64] sm:$0xf0]  ;;  %v815_v38 = vor.u32 %v1084_v28, %v814_v27  ;;  %v819_v43 = vor.u32 %v1083_v31, %v816_v32 }
  0x25   :  { %v975_v33 = vor.u32 %v1124_v30, %v974_v25  ;;  %459 = vmatpush.bf16.msra.mxu2 %v911_v29  ;;  %v966_v36 = vld [vmem:[#allocation7 + $0xe0] sm:$0xf]  ;;  %v1122_v37 = vld [vmem:[#allocation7 + $0xe4] sm:$0xf0]  ;;  %v903_v41 = vor.u32 %v1106_v35, %v902_v34  ;;  %v1081_v44 = vld [vmem:[#allocation5 + $0x24] sm:$0xf] }
  0x26   :  { %v806_v39 = vld [vmem:[#allocation5 + $0x20] sm:$0xf]  ;;  %v1082_v40 = vld [vmem:[#allocation5 + $0x24] sm:$0xf0]  ;;  %v967_v42 = vor.u32 %v1122_v37, %v966_v36  ;;  %v894_v45 = vld [vmem:[#allocation7 + $0x50] sm:$0xf] }
  0x27   :  { %228 = vmatpush.bf16.msra.mxu0 %v831_v16  ;;  %473 = vmatpush.bf16.msra.mxu3 %v975_v33  ;;  %v1104_v46 = vld [vmem:[#allocation7 + $0x54] sm:$0xf0]  ;;  %v808_v47 = vld [vmem:[#allocation5 + $0x28] sm:$0xf0]  ;;  %v958_v48 = vld [vmem:[#allocation7 + $0xd0] sm:$0xf]  ;;  %v807_v51 = vor.u32 %v1082_v40, %v806_v39 }
  0x28   :  { %242 = vmatpush.bf16.msra.mxu1 %v835_v17  ;;  %v1120_v49 = vld [vmem:[#allocation7 + $0xd4] sm:$0xf0]  ;;  %v895_v50 = vor.u32 %v1104_v46, %v894_v45  ;;  %v798_v52 = vld [vmem:[#allocation5 + $0x10] sm:$0xf]  ;;  %v886_v54 = vld [vmem:[#allocation7 + $0x40] sm:$0xf]  ;;  %v811_v56 = vor.u32 %v1081_v44, %v808_v47 }
  0x29   :  { %460 = vmatpush.bf16.msra.mxu2 %v903_v41  ;;  %v959_v53 = vor.u32 %v1120_v49, %v958_v48  ;;  %v1102_v55 = vld [vmem:[#allocation7 + $0x44] sm:$0xf0]  ;;  %v1080_v57 = vld [vmem:[#allocation5 + $0x14] sm:$0xf0]  ;;  %v950_v58 = vld [vmem:[#allocation7 + $0xc0] sm:$0xf] }
  0x2a   :  { %v1118_v59 = vld [vmem:[#allocation7 + $0xc4] sm:$0xf0]  ;;  %v1079_v60 = vld [vmem:[#allocation5 + $0x14] sm:$0xf]  ;;  %v800_v61 = vld [vmem:[#allocation5 + $0x18] sm:$0xf0]  ;;  %v887_v62 = vor.u32 %v1102_v55, %v886_v54  ;;  %v799_v63 = vor.u32 %v1080_v57, %v798_v52 }
  0x2b   :  { %229 = vmatpush.bf16.msra.mxu0 %v823_v22  ;;  %474 = vmatpush.bf16.msra.mxu3 %v967_v42  ;;  %v951_v0 = vor.u32 %v1118_v59, %v950_v58  ;;  %v803_v1 = vor.u32 %v1079_v60, %v800_v61  ;;  %v790_v2 = vld [vmem:[#allocation5] sm:$0xf]  ;;  %v1078_v3 = vld [vmem:[#allocation5 + $0x4] sm:$0xf0]  ;;  %v1077_v4 = vld [vmem:[#allocation5 + $0x4] sm:$0xf] }
  0x2c   :  { %243 = vmatpush.bf16.msra.mxu1 %v827_v26  ;;  %v792_v5 = vld [vmem:[#allocation5 + $0x8] sm:$0xf0]  ;;  %v1107_v6 = vld [vmem:[#allocation7 + $0x74] sm:$0xf]  ;;  %v912_v7 = vld [vmem:[#allocation7 + $0x78] sm:$0xf0]  ;;  %v791_v10 = vor.u32 %v1078_v3, %v790_v2 }
  0x2d   :  { %461 = vmatpush.bf16.msra.mxu2 %v895_v50  ;;  %v1123_v8 = vld [vmem:[#allocation7 + $0xf4] sm:$0xf]  ;;  %v976_v9 = vld [vmem:[#allocation7 + $0xf8] sm:$0xf0]  ;;  %v795_v11 = vor.u32 %v1077_v4, %v792_v5  ;;  %v915_v12 = vor.u32 %v1107_v6, %v912_v7  ;;  %v1105_v14 = vld [vmem:[#allocation7 + $0x64] sm:$0xf] }
  0x2e   :  { %v979_v13 = vor.u32 %v1123_v8, %v976_v9  ;;  %v904_v15 = vld [vmem:[#allocation7 + $0x68] sm:$0xf0]  ;;  %v1076_v16 = vld [vmem:[#allocation2] sm:$0xff]  ;;  %v1121_v17 = vld [vmem:[#allocation7 + $0xe4] sm:$0xf]  ;;  %s1348_s4 = smov [#allocation13]  }
  0x2f   :  { %230 = vmatpush.bf16.msra.mxu0 %v815_v38  ;;  %475 = vmatpush.bf16.msra.mxu3 %v959_v53  ;;  %v968_v18 = vld [vmem:[#allocation7 + $0xe8] sm:$0xf0]  ;;  %v907_v19 = vor.u32 %v1105_v14, %v904_v15  ;;  %v1103_v21 = vld [vmem:[#allocation7 + $0x54] sm:$0xf]  ;;  %v896_v22 = vld [vmem:[#allocation7 + $0x58] sm:$0xf0] }
  0x30   :  { %244 = vmatpush.bf16.msra.mxu1 %v819_v43  ;;  %v971_v20 = vor.u32 %v1121_v17, %v968_v18  ;;  %v1119_v23 = vld [vmem:[#allocation7 + $0xd4] sm:$0xf]  ;;  %v960_v24 = vld [vmem:[#allocation7 + $0xd8] sm:$0xf0]  ;;  %v899_v25 = vor.u32 %v1103_v21, %v896_v22  ;;  %v1101_v27 = vld [vmem:[#allocation7 + $0x44] sm:$0xf] }
  0x31   :  { %462 = vmatpush.bf16.msra.mxu2 %v887_v62  ;;  %v963_v26 = vor.u32 %v1119_v23, %v960_v24  ;;  %v888_v28 = vld [vmem:[#allocation7 + $0x48] sm:$0xf0]  ;;  %v1117_v29 = vld [vmem:[#allocation7 + $0xc4] sm:$0xf]  ;;  %v878_v33 = vld [vmem:[#allocation7 + $0x30] sm:$0xf] }
  0x32   :  { %v952_v30 = vld [vmem:[#allocation7 + $0xc8] sm:$0xf0]  ;;  %v891_v31 = vor.u32 %v1101_v27, %v888_v28  ;;  %v1100_v34 = vld [vmem:[#allocation7 + $0x34] sm:$0xf0]  ;;  %v942_v35 = vld [vmem:[#allocation7 + $0xb0] sm:$0xf] }
  0x33   :  { %231 = vmatpush.bf16.msra.mxu0 %v807_v51  ;;  %476 = vmatpush.bf16.msra.mxu3 %v951_v0  ;;  %v955_v32 = vor.u32 %v1117_v29, %v952_v30  ;;  %v879_v36 = vor.u32 %v1100_v34, %v878_v33  ;;  %v1116_v37 = vld [vmem:[#allocation7 + $0xb4] sm:$0xf0]  ;;  %v1099_v38 = vld [vmem:[#allocation7 + $0x34] sm:$0xf]  ;;  %v880_v39 = vld [vmem:[#allocation7 + $0x38] sm:$0xf0] }
  0x34   :  { %245 = vmatpush.bf16.msra.mxu1 %v811_v56  ;;  %v943_v40 = vor.u32 %v1116_v37, %v942_v35  ;;  %v883_v41 = vor.u32 %v1099_v38, %v880_v39  ;;  %v1115_v42 = vld [vmem:[#allocation7 + $0xb4] sm:$0xf]  ;;  %v944_v43 = vld [vmem:[#allocation7 + $0xb8] sm:$0xf0]  ;;  %v870_v45 = vld [vmem:[#allocation7 + $0x20] sm:$0xf] }
  0x35   :  { %463 = vmatpush.bf16.msra.mxu2 %v879_v36  ;;  %v947_v44 = vor.u32 %v1115_v42, %v944_v43  ;;  %v1098_v46 = vld [vmem:[#allocation7 + $0x24] sm:$0xf0]  ;;  %v934_v48 = vld [vmem:[#allocation7 + $0xa0] sm:$0xf]  ;;  %v1097_v50 = vld [vmem:[#allocation7 + $0x24] sm:$0xf] }
  0x36   :  { %v871_v47 = vor.u32 %v1098_v46, %v870_v45  ;;  %v1114_v49 = vld [vmem:[#allocation7 + $0xa4] sm:$0xf0]  ;;  %v872_v52 = vld [vmem:[#allocation7 + $0x28] sm:$0xf0]  ;;  %v1113_v53 = vld [vmem:[#allocation7 + $0xa4] sm:$0xf] }
  0x37   :  { %232 = vmatpush.bf16.msra.mxu0 %v799_v63  ;;  %477 = vmatpush.bf16.msra.mxu3 %v943_v40  ;;  %v935_v51 = vor.u32 %v1114_v49, %v934_v48  ;;  %v936_v54 = vld [vmem:[#allocation7 + $0xa8] sm:$0xf0]  ;;  %v875_v55 = vor.u32 %v1097_v50, %v872_v52  ;;  %v862_v57 = vld [vmem:[#allocation7 + $0x10] sm:$0xf]  ;;  %v1096_v58 = vld [vmem:[#allocation7 + $0x14] sm:$0xf0] }
  0x38   :  { %246 = vmatpush.bf16.msra.mxu1 %v803_v1  ;;  %v939_v56 = vor.u32 %v1113_v53, %v936_v54  ;;  %v926_v59 = vld [vmem:[#allocation7 + $0x90] sm:$0xf]  ;;  %v863_v60 = vor.u32 %v1096_v58, %v862_v57  ;;  %v1112_v61 = vld [vmem:[#allocation7 + $0x94] sm:$0xf0]  ;;  %v1095_v62 = vld [vmem:[#allocation7 + $0x14] sm:$0xf] }
  0x39   :  { %464 = vmatpush.bf16.msra.mxu2 %v871_v47  ;;  %v864_v63 = vld [vmem:[#allocation7 + $0x18] sm:$0xf0]  ;;  %v927_v0 = vor.u32 %v1112_v61, %v926_v59  ;;  %v1111_v2 = vld [vmem:[#allocation7 + $0x94] sm:$0xf]  ;;  %v854_v5 = vld [vmem:[#allocation7] sm:$0xf] }
  0x3a   :  { %v867_v1 = vor.u32 %v1095_v62, %v864_v63  ;;  %v928_v3 = vld [vmem:[#allocation7 + $0x98] sm:$0xf0]  ;;  %v1094_v6 = vld [vmem:[#allocation7 + $0x4] sm:$0xf0]  ;;  %v918_v7 = vld [vmem:[#allocation7 + $0x80] sm:$0xf] }
  0x3b   :  { %233 = vmatpush.bf16.msra.mxu0 %v791_v10  ;;  %478 = vmatpush.bf16.msra.mxu3 %v935_v51  ;;  %v931_v4 = vor.u32 %v1111_v2, %v928_v3  ;;  %v855_v8 = vor.u32 %v1094_v6, %v854_v5  ;;  %v1110_v9 = vld [vmem:[#allocation7 + $0x84] sm:$0xf0]  ;;  %v1093_v10 = vld [vmem:[#allocation7 + $0x4] sm:$0xf]  ;;  %v920_v15 = vld [vmem:[#allocation7 + $0x88] sm:$0xf0] }
  0x3c   :  { %247 = vmatpush.bf16.msra.mxu1 %v795_v11  ;;  %v856_v11 = vld [vmem:[#allocation7 + $0x8] sm:$0xf0]  ;;  %v1109_v14 = vld [vmem:[#allocation7 + $0x84] sm:$0xf]  ;;  %v1140_v17 = vld [vmem:[#allocation8 + $0x78] sm:$0xff]  ;;  %s766_s5 = sshll.u32 %s1348_s4, 4  ;;  %s767_s5 = int_to_ptr.vmem [resolvable:$true] %s766_s5 }
  0x3d   :  { %465 = vmatpush.bf16.msra.mxu2 %v863_v60  ;;  %v1132_v18 = vld [vmem:[#allocation8 + $0x38] sm:$0xff]  ;;  %v1138_v21 = vld [vmem:[#allocation8 + $0x68] sm:$0xff]  ;;  %v1137_v22 = vld [vmem:[#allocation8 + $0x60] sm:$0xff]  ;;  %s768_s7 = sshll.u32 %s1420_s6, 4  ;;  %s769_s7 = int_to_ptr.hbm [resolvable:$true] %s768_s7 }
  0x3e   :  { %234 = vmatmul.bf16.vlgmr.msra.gmra.mxu0 %v1076_v16  ;;  %v134_v23 = vld [vmem:[#allocation11] ss:$8 sm:$0x3]  ;;  %v1135_v43 = vld [vmem:[#allocation8 + $0x50] sm:$0xff]  ;;  %v1148_v50 = vld [vmem:[#allocation10 + $0x38] sm:$0xff] }
  0x3f   :  { %487 = vmatpush.bf16.msrb.mxu0 %v915_v12  ;;  %248 = vmatmul.bf16.vlgmr.msra.gmra.mxu1 %v1076_v16  ;;  %v919_v12 = vor.u32 %v1110_v9, %v918_v7  ;;  %v923_v16 = vor.u32 %v1109_v14, %v920_v15  ;;  %v137_v27 = vperm.slane %v134_v23, 1  ;;  %v1130_v40 = vld [vmem:[#allocation8 + $0x28] sm:$0xff]  ;;  %v1129_v42 = vld [vmem:[#allocation8 + $0x20] sm:$0xff]  ;;  %v1127_v46 = vld [vmem:[#allocation8 + $0x10] sm:$0xff] }
  0x40   :  { %501 = vmatpush.bf16.msrb.mxu1 %v979_v13  ;;  %479 = vmatpush.bf16.msra.mxu3 %v927_v0  ;;  %v859_v13 = vor.u32 %v1093_v10, %v856_v11  ;;  %v1134_v45 = vld [vmem:[#allocation8 + $0x48] sm:$0xff]  ;;  %v1133_v47 = vld [vmem:[#allocation8 + $0x40] sm:$0xff]  ;;  %v1147_v51 = vld [vmem:[#allocation10 + $0x30] sm:$0xff] }
  0x41   :  { %466 = vmatpush.bf16.msra.mxu2 %v855_v8  ;;  %v1126_v48 = vld [vmem:[#allocation8 + $0x8] sm:$0xff]  ;;  %v1125_v49 = vld [vmem:[#allocation8] sm:$0xff]  ;;  %v1144_v15 = vld [vmem:[#allocation10 + $0x18] sm:$0xff] }
  0x42   :  { %v293_v52 = vld [vmem:[#allocation11 + $0x1] ss:$8 sm:$0x3] }
  0x43   :  { %488 = vmatpush.bf16.msrb.mxu0 %v907_v19  ;;  %v1139_v19 = vld [vmem:[#allocation8 + $0x70] sm:$0xff]  ;;  %v296_v54 = vperm.slane %v293_v52, 1  ;;  %v295_v58 = vperm.slane %v293_v52, 0  ;;  %v1145_v14 = vld [vmem:[#allocation10 + $0x20] sm:$0xff] }
  0x44   :  { %502 = vmatpush.bf16.msrb.mxu1 %v971_v20  ;;  %480 = vmatpush.bf16.msra.mxu3 %v919_v12  ;;  %v1131_v20 = vld [vmem:[#allocation8 + $0x30] sm:$0xff] }
  0x45   :  { %650 = vmatpush.bf16.msrb.mxu2 %v1132_v18  ;;  %v1141_v18 = vld [vmem:[#allocation10] sm:$0xff] }
  0x47   :  { %489 = vmatpush.bf16.msrb.mxu0 %v899_v25 }
  0x48   :  { %503 = vmatpush.bf16.msrb.mxu1 %v963_v26  ;;  %664 = vmatpush.bf16.msrb.mxu3 %v1140_v17  ;;  %v136_v26 = vperm.slane %v134_v23, 0  ;;  %v1142_v17 = vld [vmem:[#allocation10 + $0x8] sm:$0xff] }
  0x49   :  { %651 = vmatpush.bf16.msrb.mxu2 %v1131_v20 }
  0x4b   :  { %490 = vmatpush.bf16.msrb.mxu0 %v891_v31 }
  0x4c   :  { %504 = vmatpush.bf16.msrb.mxu1 %v955_v32  ;;  %665 = vmatpush.bf16.msrb.mxu3 %v1139_v19 }
  0x4d   :  { %652 = vmatpush.bf16.msrb.mxu2 %v1130_v40 }
  0x4f   :  { %491 = vmatpush.bf16.msrb.mxu0 %v883_v41  ;;  %v1136_v41 = vld [vmem:[#allocation8 + $0x58] sm:$0xff] }
  0x50   :  { %505 = vmatpush.bf16.msrb.mxu1 %v947_v44  ;;  %666 = vmatpush.bf16.msrb.mxu3 %v1138_v21  ;;  %v1128_v44 = vld [vmem:[#allocation8 + $0x18] sm:$0xff]  ;;  %v553_v21 = vld [vmem:[#allocation11 + $0x2] ss:$0 sm:$0xff] }
  0x51   :  { %653 = vmatpush.bf16.msrb.mxu2 %v1129_v42 }
  0x53   :  { %492 = vmatpush.bf16.msrb.mxu0 %v875_v55 }
  0x54   :  { %506 = vmatpush.bf16.msrb.mxu1 %v939_v56  ;;  %667 = vmatpush.bf16.msrb.mxu3 %v1137_v22 }
  0x55   :  { %654 = vmatpush.bf16.msrb.mxu2 %v1128_v44 }
  0x57   :  { %493 = vmatpush.bf16.msrb.mxu0 %v867_v1 }
  0x58   :  { %507 = vmatpush.bf16.msrb.mxu1 %v931_v4  ;;  %668 = vmatpush.bf16.msrb.mxu3 %v1136_v41 }
  0x59   :  { %655 = vmatpush.bf16.msrb.mxu2 %v1127_v46 }
  0x5b   :  { %494 = vmatpush.bf16.msrb.mxu0 %v859_v13  ;;  %v1146_v13 = vld [vmem:[#allocation10 + $0x28] sm:$0xff] }
  0x5c   :  { %508 = vmatpush.bf16.msrb.mxu1 %v923_v16  ;;  %669 = vmatpush.bf16.msrb.mxu3 %v1135_v43  ;;  %v1143_v16 = vld [vmem:[#allocation10 + $0x10] sm:$0xff] }
  0x5d   :  { %656 = vmatpush.bf16.msrb.mxu2 %v1126_v48 }
  0x5f   :  { %746 = vmatpush.bf16.msra.mxu0 %v1148_v50 }
  0x60   :  { %670 = vmatpush.bf16.msrb.mxu3 %v1134_v45 }
  0x61   :  { %657 = vmatpush.bf16.msrb.mxu2 %v1125_v49 }
  0x63   :  { %747 = vmatpush.bf16.msra.mxu0 %v1147_v51 }
  0x64   :  { %671 = vmatpush.bf16.msrb.mxu3 %v1133_v47 }
  0x67   :  { %748 = vmatpush.bf16.msra.mxu0 %v1146_v13 }
  0x6b   :  { %749 = vmatpush.bf16.msra.mxu0 %v1145_v14 }
  0x6f   :  { %750 = vmatpush.bf16.msra.mxu0 %v1144_v15 }
  0x73   :  { %751 = vmatpush.bf16.msra.mxu0 %v1143_v16 }
  0x77   :  { %752 = vmatpush.bf16.msra.mxu0 %v1142_v17 }
  0x7b   :  { %753 = vmatpush.bf16.msra.mxu0 %v1141_v18 }
  0xbb   :  { %v235_v24 = vpop.f32.mrf.mxu0 }
  0xbc   :  { %v249_v25 = vpop.f32.mrf.mxu1  ;;  %v236_v28 = vadd.f32 %v235_v24, %v136_v26 }
  0xbd   :  { %v250_v29 = vadd.f32 %v249_v25, %v137_v27 }
  0xbe   :  { %v254_v34 = vmax.f32 %v236_v28, 0.0 }
  0xbf   :  { %v255_v36 = vmax.f32 %v250_v29, 0.0 }
  0xc3   :  { %v237_v30 = vpop.f32.mrf.mxu0 }
  0xc4   :  { %v238_v31 = vadd.f32 %v237_v30, %v136_v26  ;;  %v251_v32 = vpop.f32.mrf.mxu1 }
  0xc5   :  { %v252_v33 = vadd.f32 %v251_v32, %v137_v27 }
  0xc6   :  { %v256_v35 = vmax.f32 %v238_v31, 0.0  ;;  %v697_v31 = vld [vmem:[#allocation11 + $0x3] ss:$0 sm:$0xff] }
  0xc7   :  { %v257_v37 = vmax.f32 %v252_v33, 0.0 }
  0xc8   :  { %v258_v38 = vpack.c.bf16 %v256_v35, %v254_v34 }
  0xc9   :  { %v259_v39 = vpack.c.bf16 %v257_v37, %v255_v36 }
  0xca   :  { %467 = vmatmul.bf16.vlgmr.msra.gmra.mxu2 %v258_v38  ;;  %495 = vmatmul.bf16.vlgmr.msrb.gmra.mxu0 %v258_v38 }
  0xcb   :  { %481 = vmatmul.bf16.vlgmr.msra.gmra.mxu3 %v259_v39  ;;  %509 = vmatmul.bf16.vlgmr.msrb.gmra.mxu1 %v259_v39 }
 0x147   :  { %v496_v53 = vpop.f32.mrf.mxu0 }
 0x148   :  { %v510_v55 = vpop.f32.mrf.mxu1  ;;  %v497_v56 = vadd.f32 %v496_v53, %v296_v54 }
 0x14a   :  { %v511_v61 = vadd.f32 %v510_v55, %v497_v56 }
 0x14c   :  { %v516_v2 = vmax.f32 %v511_v61, 0.0 }
 0x14d   :  { %v468_v57 = vpop.f32.mrf.mxu2 }
 0x14e   :  { %v482_v59 = vpop.f32.mrf.mxu3  ;;  %v469_v0 = vadd.f32 %v468_v57, %v295_v58 }
 0x14f   :  { %v498_v60 = vpop.f32.mrf.mxu0 }
 0x150   :  { %v499_v62 = vadd.f32 %v498_v60, %v296_v54  ;;  %v512_v63 = vpop.f32.mrf.mxu1  ;;  %v483_v5 = vadd.f32 %v482_v59, %v469_v0 }
 0x152   :  { %v513_v1 = vadd.f32 %v512_v63, %v499_v62  ;;  %v515_v10 = vmax.f32 %v483_v5, 0.0 }
 0x154   :  { %v518_v3 = vmax.f32 %v513_v1, 0.0 }
 0x155   :  { %v470_v4 = vpop.f32.mrf.mxu2 }
 0x156   :  { %v520_v6 = vpack.c.bf16 %v518_v3, %v516_v2  ;;  %v471_v7 = vadd.f32 %v470_v4, %v295_v58  ;;  %v484_v8 = vpop.f32.mrf.mxu3 }
 0x158   :  { %v485_v9 = vadd.f32 %v484_v8, %v471_v7  ;;  %672 = vmatmul.bf16.vlgmr.msrb.gmra.mxu3 %v520_v6 }
 0x15a   :  { %v517_v11 = vmax.f32 %v485_v9, 0.0 }
 0x15c   :  { %v519_v12 = vpack.c.bf16 %v517_v11, %v515_v10 }
 0x15e   :  { %658 = vmatmul.bf16.vlgmr.msrb.gmra.mxu2 %v519_v12 }
 0x1db   :  { %v673_v19 = vpop.f32.mrf.mxu3 }
 0x1e1   :  { %v659_v20 = vpop.f32.mrf.mxu2 }
 0x1e2   :  { %v660_v22 = vadd.f32 %v659_v20, %v553_v21 }
 0x1e3   :  { %v675_v26 = vpop.f32.mrf.mxu3 }
 0x1e4   :  { %v674_v24 = vadd.f32 %v673_v19, %v660_v22 }
 0x1e6   :  { %v678_v28 = vmax.f32 %v674_v24, 0.0 }
 0x1e9   :  { %v661_v23 = vpop.f32.mrf.mxu2 }
 0x1ea   :  { %v662_v25 = vadd.f32 %v661_v23, %v553_v21 }
 0x1ec   :  { %v676_v27 = vadd.f32 %v675_v26, %v662_v25 }
 0x1ee   :  { %v679_v29 = vmax.f32 %v676_v27, 0.0 }
 0x1f0   :  { %v680_v30 = vpack.c.bf16 %v679_v29, %v678_v28 }
 0x1f2   :  { %754 = vmatmul.bf16.vlgmr.msra.gmra.mxu0 %v680_v30 }
 0x26f   :  { %v755_v32 = vpop.f32.mrf.mxu0 }
 0x270   :  { %v756_v33 = vadd.f32 %v755_v32, %v697_v31 }
 0x272   :  { %760 = vst [vmem:[#allocation13] sm:$0xff] %v756_v33 }
 0x277   :  { %v757_v34 = vpop.f32.mrf.mxu0 }
 0x278   :  { %v758_v35 = vadd.f32 %v757_v34, %v697_v31 }
 0x27a   :  { %761 = vst [vmem:[#allocation13 + $0x8] sm:$0xff] %v758_v35 }
 0x27b   :  { %774 = dma.vmem_to_hbm [thread:$0]  %s767_s5, 256, %s769_s7, [#allocation4], %s1339_s26, %s1339_s26, %s1340_s27  }
 0x27c   :  { %1336 = dma.done.wait [#allocation4], 256  }
 0x27d   :  { %1337 = vsyncadd [#allocation4], 4294967040 }
 0x27e   :  { %779 = vsyncpa [#allocation3], 1 }
 0x27f   :  { %780 = vsyncpa [#allocation6], 1 }
 0x280   :  { %781 = vsyncpa [#allocation9], 1 }
 0x281   :  { %782 = vsyncpa [#allocation12], 1 }
 0x282   :  { %783 = vsyncpa [#allocation4], 1 }

</bundles_post_ra>
